<compile_context>
chip_gen: v7x
topology: tpu7x:2x2x1
jax: 0.10.0
libtpu: 0.0.40
codegen_flags: <defaults>
</compile_context>

<pallas_src>
import functools

import jax
import jax.numpy as jnp
from jax.experimental import pallas as pl
from jax.experimental.pallas import tpu as pltpu

LANE = 128  # output columns padded to one full lane width


def _softplus(x):
    # Match torch.nn.functional.softplus (beta=1, threshold=20).
    # The inner minimum() clamp keeps exp() finite even on padded/garbage rows.
    return jnp.where(x > 20.0, x, jnp.log1p(jnp.exp(jnp.minimum(x, 20.0))))


def policy_mlp_kernel(x_ref, w1_ref, b1_ref, w2_ref, b2_ref,
                      w3_ref, b3_ref, w4_ref, b4_ref, out_ref):
    """4-layer MLP + softplus; one packed lane-dense (rows, 128) output tile."""
    x = x_ref[...]

    h = jnp.dot(x, w1_ref[...], preferred_element_type=jnp.float32) + b1_ref[...]
    h = jnp.maximum(h, 0.0)

    h = jnp.dot(h, w2_ref[...], preferred_element_type=jnp.float32) + b2_ref[...]
    h = jnp.maximum(h, 0.0)

    h = jnp.dot(h, w3_ref[...], preferred_element_type=jnp.float32) + b3_ref[...]
    h = jnp.maximum(h, 0.0)

    z = jnp.dot(h, w4_ref[...], preferred_element_type=jnp.float32) + b4_ref[...]

    out_ref[...] = _softplus(z) + 0.001


@functools.partial(jax.jit,
                   static_argnames=("output_size", "block_rows", "grid_less_rows"))
def policy_network_forward(x, params, output_size,
                           block_rows=2048, grid_less_rows=4096):
    """x: (B, input_size) f32. params: dict w1..w4 / b1..b4 (w4/b4 lane-padded).

    Returns (alpha, beta), each (B, output_size).
    """
    batch, input_size = x.shape
    hidden = params["w1"].shape[1]
    out_cols_p = params["w4"].shape[1]       # lane-padded (>= 2 * output_size)

    weights = (params["w1"], params["b1"],
               params["w2"], params["b2"],
               params["w3"], params["b3"],
               params["w4"], params["b4"])

    # Advisory cost estimate: this kernel is launch/latency-bound at these shapes.
    flops = 2 * batch * (input_size * hidden + 2 * hidden * hidden
                         + hidden * out_cols_p)
    transcendentals = 2 * batch * out_cols_p          # exp + log1p per output elem
    bytes_accessed = 4 * (x.size + sum(int(p.size) for p in params.values())
                          + batch * out_cols_p)
    cost = pl.CostEstimate(flops=int(flops),
                           transcendentals=int(transcendentals),
                           bytes_accessed=int(bytes_accessed))

    if batch <= grid_less_rows:
        # Grid-less path: whole arrays live in VMEM, single kernel invocation,
        # zero per-step pipeline overhead, no pad/slice wrapper ops.
        vmem = pl.BlockSpec(memory_space=pltpu.MemorySpace.VMEM)
        ab = pl.pallas_call(
            policy_mlp_kernel,
            out_shape=jax.ShapeDtypeStruct((batch, out_cols_p), jnp.float32),
            in_specs=[vmem] * 9,
            out_specs=vmem,
            cost_estimate=cost,
        )(x, *weights)
    else:
        # Batched path: 1-D grid over large row blocks; weights/biases stay
        # VMEM-resident (index_map always returns block 0).  No wrapper-side
        # padding: Pallas handles the ragged last block (OOB reads are harmless,
        # OOB writes are dropped).
        num_blocks = pl.cdiv(batch, block_rows)
        resident = [pl.BlockSpec(w.shape, lambda i: (0, 0)) for w in weights]
        ab = pl.pallas_call(
            policy_mlp_kernel,
            out_shape=jax.ShapeDtypeStruct((batch, out_cols_p), jnp.float32),
            grid=(num_blocks,),
            in_specs=[pl.BlockSpec((block_rows, input_size), lambda i: (i, 0))]
                     + resident,
            out_specs=pl.BlockSpec((block_rows, out_cols_p), lambda i: (i, 0)),
            compiler_params=pltpu.CompilerParams(
                dimension_semantics=("parallel",)),
            cost_estimate=cost,
        )(x, *weights)

    # alpha / beta split is a free slice outside the kernel (lane-dense output).
    return ab[:, :output_size], ab[:, output_size:2 * output_size]


def init_params(key, input_size, hidden_size, output_size):
    """PyTorch-Linear-style U(-1/sqrt(fan_in), +1/sqrt(fan_in)) init.

    Weights stored as (in, out) (transpose of PyTorch's (out, in)); biases kept
    2-D (1, out).  The final layer's weight/bias are zero-padded along the output
    axis up to LANE (=128) columns so the kernel's output tile is lane-dense.
    """
    out_cols = 2 * output_size
    dims = [(input_size, hidden_size),
            (hidden_size, hidden_size),
            (hidden_size, hidden_size),
            (hidden_size, out_cols)]
    params = {}
    for idx, (fan_in, fan_out) in enumerate(dims, start=1):
        key, kw, kb = jax.random.split(key, 3)
        bound = 1.0 / jnp.sqrt(jnp.float32(fan_in))
        w = jax.random.uniform(kw, (fan_in, fan_out), jnp.float32, -bound, bound)
        b = jax.random.uniform(kb, (1, fan_out), jnp.float32, -bound, bound)
        if idx == 4 and fan_out < LANE:
            # Lane-pad the final layer: extra columns are zero weights/bias and are
            # sliced off in the wrapper.
            w = jnp.pad(w, ((0, 0), (0, LANE - fan_out)))
            b = jnp.pad(b, ((0, 0), (0, LANE - fan_out)))
        params[f"w{idx}"] = w
        params[f"b{idx}"] = b
    return params


def reference_forward(x, params, output_size):
    """Plain-JAX reference for sanity checking (uses only the real columns)."""
    h = x
    for i in (1, 2, 3):
        h = jnp.maximum(h @ params[f"w{i}"] + params[f"b{i}"], 0.0)
    out_cols = 2 * output_size
    z = h @ params["w4"][:, :out_cols] + params["b4"][:, :out_cols]
    ab = jax.nn.softplus(z) + 0.001
    return ab[:, :output_size], ab[:, output_size:]


if __name__ == "__main__":
    input_size, hidden_size, output_size = 16, 32, 4

    key = jax.random.PRNGKey(0)
    key, kx = jax.random.split(key)
    params = init_params(key, input_size, hidden_size, output_size)

    # --- small batch: grid-less path ---
    batch = 2
    x = jax.random.normal(kx, (batch, input_size), jnp.float32)
    alpha, beta = policy_network_forward(x, params, output_size)
    jax.block_until_ready((alpha, beta))

    ref_alpha, ref_beta = reference_forward(x, params, output_size)
    assert alpha.shape == (batch, output_size)
    assert beta.shape == (batch, output_size)
    assert jnp.allclose(alpha, ref_alpha, atol=1e-5, rtol=1e-5)
    assert jnp.allclose(beta, ref_beta, atol=1e-5, rtol=1e-5)
    assert bool(jnp.all(alpha > 0)) and bool(jnp.all(beta > 0))

    # --- moderate batch: still grid-less (threshold raised per perf review) ---
    key, kx2 = jax.random.split(key)
    mid_batch = 1000
    xm = jax.random.normal(kx2, (mid_batch, input_size), jnp.float32)
    alpha_m, beta_m = policy_network_forward(xm, params, output_size)
    jax.block_until_ready((alpha_m, beta_m))
    ref_alpha_m, ref_beta_m = reference_forward(xm, params, output_size)
    assert jnp.allclose(alpha_m, ref_alpha_m, atol=1e-5, rtol=1e-5)
    assert jnp.allclose(beta_m, ref_beta_m, atol=1e-5, rtol=1e-5)

    # --- large batch: exercises the 1-D batch grid with a ragged last block
    #     (no wrapper pad/slice; OOB rows are computed-and-dropped) ---
    key, kx3 = jax.random.split(key)
    big_batch = 4500  # > grid_less_rows, not a multiple of block_rows
    xb = jax.random.normal(kx3, (big_batch, input_size), jnp.float32)
    alpha_b, beta_b = policy_network_forward(xb, params, output_size,
                                             block_rows=2048, grid_less_rows=2048)
    jax.block_until_ready((alpha_b, beta_b))

    ref_alpha_b, ref_beta_b = reference_forward(xb, params, output_size)
    assert alpha_b.shape == (big_batch, output_size)
    assert jnp.allclose(alpha_b, ref_alpha_b, atol=1e-5, rtol=1e-5)
    assert jnp.allclose(beta_b, ref_beta_b, atol=1e-5, rtol=1e-5)

    print("KERNEL_OK")
</pallas_src>

<mosaic_0001>
module attributes {stable_mosaic.version = 11 : i64} {
  func.func @policy_mlp_kernel(%arg0: memref<2x16xf32, #tpu.memory_space<vmem>>, %arg1: memref<16x32xf32, #tpu.memory_space<vmem>>, %arg2: memref<1x32xf32, #tpu.memory_space<vmem>>, %arg3: memref<32x32xf32, #tpu.memory_space<vmem>>, %arg4: memref<1x32xf32, #tpu.memory_space<vmem>>, %arg5: memref<32x32xf32, #tpu.memory_space<vmem>>, %arg6: memref<1x32xf32, #tpu.memory_space<vmem>>, %arg7: memref<32x128xf32, #tpu.memory_space<vmem>>, %arg8: memref<1x128xf32, #tpu.memory_space<vmem>>, %arg9: memref<2x128xf32, #tpu.memory_space<vmem>>) attributes {dimension_semantics = [], scalar_prefetch = 0 : i64, scratch_operands = 0 : i64, tpu.core_type = #tpu.core_type<tc>} {
    %c0 = arith.constant 0 : index
    %c0_0 = arith.constant 0 : index
    %0 = vector.load %arg0[%c0, %c0_0] : memref<2x16xf32, #tpu.memory_space<vmem>>, vector<2x16xf32>
    %c0_1 = arith.constant 0 : index
    %c0_2 = arith.constant 0 : index
    %1 = vector.load %arg1[%c0_1, %c0_2] : memref<16x32xf32, #tpu.memory_space<vmem>>, vector<16x32xf32>
    %cst = arith.constant dense<0.000000e+00> : vector<2x32xf32>
    %2 = tpu.matmul %0, %1, %cst {dimension_numbers = #tpu.dot_dimension_numbers<[1], [0], [0], [1], [0, 0, 1, 1], [], []>} : vector<2x16xf32>, vector<16x32xf32>, vector<2x32xf32> -> vector<2x32xf32>
    %c0_3 = arith.constant 0 : index
    %c0_4 = arith.constant 0 : index
    %3 = vector.load %arg2[%c0_3, %c0_4] : memref<1x32xf32, #tpu.memory_space<vmem>>, vector<1x32xf32>
    %4 = vector.broadcast %3 : vector<1x32xf32> to vector<2x32xf32>
    %5 = arith.addf %2, %4 : vector<2x32xf32>
    %cst_5 = arith.constant 0.000000e+00 : f32
    %6 = vector.broadcast %cst_5 : f32 to vector<2x32xf32>
    %7 = arith.maximumf %5, %6 : vector<2x32xf32>
    %c0_6 = arith.constant 0 : index
    %c0_7 = arith.constant 0 : index
    %8 = vector.load %arg3[%c0_6, %c0_7] : memref<32x32xf32, #tpu.memory_space<vmem>>, vector<32x32xf32>
    %cst_8 = arith.constant dense<0.000000e+00> : vector<2x32xf32>
    %9 = tpu.matmul %7, %8, %cst_8 {dimension_numbers = #tpu.dot_dimension_numbers<[1], [0], [0], [1], [0, 0, 1, 1], [], []>} : vector<2x32xf32>, vector<32x32xf32>, vector<2x32xf32> -> vector<2x32xf32>
    %c0_9 = arith.constant 0 : index
    %c0_10 = arith.constant 0 : index
    %10 = vector.load %arg4[%c0_9, %c0_10] : memref<1x32xf32, #tpu.memory_space<vmem>>, vector<1x32xf32>
    %11 = vector.broadcast %10 : vector<1x32xf32> to vector<2x32xf32>
    %12 = arith.addf %9, %11 : vector<2x32xf32>
    %cst_11 = arith.constant 0.000000e+00 : f32
    %13 = vector.broadcast %cst_11 : f32 to vector<2x32xf32>
    %14 = arith.maximumf %12, %13 : vector<2x32xf32>
    %c0_12 = arith.constant 0 : index
    %c0_13 = arith.constant 0 : index
    %15 = vector.load %arg5[%c0_12, %c0_13] : memref<32x32xf32, #tpu.memory_space<vmem>>, vector<32x32xf32>
    %cst_14 = arith.constant dense<0.000000e+00> : vector<2x32xf32>
    %16 = tpu.matmul %14, %15, %cst_14 {dimension_numbers = #tpu.dot_dimension_numbers<[1], [0], [0], [1], [0, 0, 1, 1], [], []>} : vector<2x32xf32>, vector<32x32xf32>, vector<2x32xf32> -> vector<2x32xf32>
    %c0_15 = arith.constant 0 : index
    %c0_16 = arith.constant 0 : index
    %17 = vector.load %arg6[%c0_15, %c0_16] : memref<1x32xf32, #tpu.memory_space<vmem>>, vector<1x32xf32>
    %18 = vector.broadcast %17 : vector<1x32xf32> to vector<2x32xf32>
    %19 = arith.addf %16, %18 : vector<2x32xf32>
    %cst_17 = arith.constant 0.000000e+00 : f32
    %20 = vector.broadcast %cst_17 : f32 to vector<2x32xf32>
    %21 = arith.maximumf %19, %20 : vector<2x32xf32>
    %c0_18 = arith.constant 0 : index
    %c0_19 = arith.constant 0 : index
    %22 = vector.load %arg7[%c0_18, %c0_19] : memref<32x128xf32, #tpu.memory_space<vmem>>, vector<32x128xf32>
    %cst_20 = arith.constant dense<0.000000e+00> : vector<2x128xf32>
    %23 = tpu.matmul %21, %22, %cst_20 {dimension_numbers = #tpu.dot_dimension_numbers<[1], [0], [0], [1], [0, 0, 1, 1], [], []>} : vector<2x32xf32>, vector<32x128xf32>, vector<2x128xf32> -> vector<2x128xf32>
    %c0_21 = arith.constant 0 : index
    %c0_22 = arith.constant 0 : index
    %24 = vector.load %arg8[%c0_21, %c0_22] : memref<1x128xf32, #tpu.memory_space<vmem>>, vector<1x128xf32>
    %25 = vector.broadcast %24 : vector<1x128xf32> to vector<2x128xf32>
    %26 = arith.addf %23, %25 : vector<2x128xf32>
    %cst_23 = arith.constant 2.000000e+01 : f32
    %27 = vector.broadcast %cst_23 : f32 to vector<2x128xf32>
    %28 = arith.cmpf ogt, %26, %27 : vector<2x128xf32>
    %cst_24 = arith.constant 2.000000e+01 : f32
    %29 = vector.broadcast %cst_24 : f32 to vector<2x128xf32>
    %30 = arith.minimumf %26, %29 : vector<2x128xf32>
    %31 = math.exp %30 : vector<2x128xf32>
    %32 = math.log1p %31 : vector<2x128xf32>
    %33 = arith.select %28, %26, %32 : vector<2x128xi1>, vector<2x128xf32>
    %cst_25 = arith.constant 1.000000e-03 : f32
    %34 = vector.broadcast %cst_25 : f32 to vector<2x128xf32>
    %35 = arith.addf %33, %34 : vector<2x128xf32>
    %c0_26 = arith.constant 0 : index
    %c0_27 = arith.constant 0 : index
    %36 = vector.load %arg9[%c0_26, %c0_27] : memref<2x128xf32, #tpu.memory_space<vmem>>, vector<2x128xf32>
    tpu.vector_store %arg9[%c0_26, %c0_27], %35 {strides = array<i32>} : memref<2x128xf32, #tpu.memory_space<vmem>>, vector<2x128xf32>,
    return
  }
}

</mosaic_0001>

<bundles_post_ra>
// kernel: policy_network_forward.1
= control target key start
LH: loop header
LB: loop body
LE: loop exit
PB: predicated region body
PF: predicated region fallthrough
CT: control target
= control target key end

     0   :  { %14 = vsyncpa [#allocation3], 0  ;;  %s878_s0 = inlined_call_operand.hbm [shape: f32[2,16], index: 0, kind: input, shape index: {}]   ;;  %s879_s1 = inlined_call_operand.vmem [shape: f32[16,32], index: 1, kind: input, shape index: {}]   ;;  %s880_s2 = inlined_call_operand.vmem [shape: f32[1,32], index: 2, kind: input, shape index: {}]   ;;  %s881_s3 = inlined_call_operand.hbm [shape: f32[32,32], index: 3, kind: input, shape index: {}]   ;;  %s882_s4 = inlined_call_operand.vmem [shape: f32[1,32], index: 4, kind: input, shape index: {}]   ;;  %s883_s5 = inlined_call_operand.hbm [shape: f32[32,32], index: 5, kind: input, shape index: {}]   ;;  %s884_s6 = inlined_call_operand.hbm [shape: f32[1,32], index: 6, kind: input, shape index: {}]   ;;  %s885_s7 = inlined_call_operand.hbm [shape: f32[32,128], index: 7, kind: input, shape index: {}]   ;;  %s886_s8 = inlined_call_operand.hbm [shape: f32[1,128], index: 8, kind: input, shape index: {}]   ;;  %s887_s9 = inlined_call_operand.vmem [shape: f32[2,128], index: 9, kind: output, shape index: {}]  }
   0x1   :  { %15 = vsyncpa [#allocation5], 0 }
   0x2   :  { %16 = vsyncpa [#allocation8], 0 }
   0x3   :  { %17 = vsyncpa [#allocation11], 0  ;;  %s714_s30 = smov [#allocation4]   ;;  %s574_s13 = scalar_lea.hbm %s881_s3, 512 }
   0x4   :  { %s37_s10 = sshll.u32 %s714_s30, 4  ;;  %p575_p0 = scmp.ne.s32.totalorder %s881_s3, %s574_s13  ;;  %s38_s10 = int_to_ptr.vmem [resolvable:$true] %s37_s10 }
   0x5   :  { %p578_p1 = scmp.lt.u32.totalorder %s574_s13, %s881_s3 }
   0x7   :  { %p580_p2 = pnand %p578_p1, %p575_p0 }
   0x9   :  { %583 = shalt.err (!%p580_p2)
}
   0xa   :  { %s584_s18 = scalar_lea.vmem %s38_s10, 512  ;;  %p589_p4 = scmp.lt.s32.totalorder %s38_s10, %s38_s10 }
   0xb   :  { %p585_p3 = scmp.ne.s32.totalorder %s38_s10, %s584_s18  ;;  %p590_p5 = scmp.lt.s32.totalorder %s584_s18, %s584_s18 }
   0xd   :  { %p591_p6 = por %p590_p5, %p589_p4 }
   0xf   :  { %p592_p7 = pnand %p591_p6, %p585_p3 }
  0x11   :  { %595 = shalt.err (!%p592_p7)
}
  0x12   :  { %s715_s19 = smov 128   ;;  %s716_s20 = smov 8  }
  0x13   :  { %43 = dma.hbm_to_vmem [thread:$0]  %s881_s3, 512, %s38_s10, [#allocation5], %s715_s19, %s715_s19, %s716_s20  }
  0x14   :  { %s717_s23 = smov [#allocation7]   ;;  %s718_s25 = smov [#allocation2]  }
  0x15   :  { %s64_s24 = sshll.u32 %s717_s23, 4  ;;  %s24_s26 = sshll.u32 %s718_s25, 4  ;;  %s65_s24 = int_to_ptr.vmem [resolvable:$true] %s64_s24  ;;  %s25_s26 = int_to_ptr.vmem [resolvable:$true] %s24_s26 }
  0x16   :  { %s596_s29 = scalar_lea.hbm %s884_s6, 16 }
  0x17   :  { %p597_p8 = scmp.ne.s32.totalorder %s884_s6, %s596_s29  ;;  %p600_p9 = scmp.lt.u32.totalorder %s596_s29, %s884_s6 }
  0x19   :  { %p602_p10 = pnand %p600_p9, %p597_p8 }
  0x1b   :  { %605 = shalt.err (!%p602_p10)
}
  0x1c   :  { %s606_s3 = scalar_lea.vmem %s65_s24, 16  ;;  %s610_s10 = scalar_lea.vmem %s65_s24, 32 }
  0x1d   :  { %p607_p11 = scmp.ne.s32.totalorder %s65_s24, %s606_s3  ;;  %p611_p12 = scmp.lt.s32.totalorder %s65_s24, %s65_s24 }
  0x1e   :  { %p612_p13 = scmp.lt.s32.totalorder %s610_s10, %s606_s3 }
  0x20   :  { %p613_p0 = por %p612_p13, %p611_p12 }
  0x22   :  { %p614_p1 = pnand %p613_p0, %p607_p11 }
  0x24   :  { %617 = shalt.err (!%p614_p1)
}
  0x25   :  { %67 = dma.hbm_to_vmem [thread:$0]  %s884_s6, 16, %s65_s24, [#allocation8]  }
  0x26   :  { %s618_s18 = scalar_lea.hbm %s878_s0, 32 }
  0x27   :  { %p619_p2 = scmp.ne.s32.totalorder %s878_s0, %s618_s18  ;;  %p622_p3 = scmp.lt.u32.totalorder %s618_s18, %s878_s0 }
  0x29   :  { %p624_p4 = pnand %p622_p3, %p619_p2 }
  0x2b   :  { %627 = shalt.err (!%p624_p4)
}
  0x2c   :  { %s628_s27 = scalar_lea.vmem %s25_s26, 32  ;;  %p633_p6 = scmp.lt.s32.totalorder %s25_s26, %s25_s26 }
  0x2d   :  { %p629_p5 = scmp.ne.s32.totalorder %s25_s26, %s628_s27  ;;  %p634_p7 = scmp.lt.s32.totalorder %s628_s27, %s628_s27 }
  0x2f   :  { %p635_p8 = por %p634_p7, %p633_p6 }
  0x31   :  { %p636_p9 = pnand %p635_p8, %p629_p5 }
  0x33   :  { %639 = shalt.err (!%p636_p9)
}
  0x34   :  { %27 = dma.hbm_to_vmem [thread:$0]  %s878_s0, 32, %s25_s26, [#allocation3]  }
  0x35   :  { %s719_s28 = smov [#allocation6]   ;;  %s720_s30 = smov [#allocation9]  }
  0x36   :  { %s51_s29 = sshll.u32 %s719_s28, 4  ;;  %s73_s11 = sshll.u32 %s720_s30, 4  ;;  %s52_s29 = int_to_ptr.vmem [resolvable:$true] %s51_s29  ;;  %s74_s11 = int_to_ptr.vmem [resolvable:$true] %s73_s11 }
  0x37   :  { %s640_s3 = scalar_lea.hbm %s883_s5, 512 }
  0x38   :  { %p641_p10 = scmp.ne.s32.totalorder %s883_s5, %s640_s3  ;;  %p644_p11 = scmp.lt.u32.totalorder %s640_s3, %s883_s5 }
  0x3a   :  { %p646_p12 = pnand %p644_p11, %p641_p10 }
  0x3c   :  { %649 = shalt.err (!%p646_p12)
}
  0x3d   :  { %s650_s0 = scalar_lea.vmem %s52_s29, 512  ;;  %p655_p0 = scmp.lt.s32.totalorder %s52_s29, %s52_s29 }
  0x3e   :  { %p651_p13 = scmp.ne.s32.totalorder %s52_s29, %s650_s0  ;;  %p656_p1 = scmp.lt.s32.totalorder %s650_s0, %s650_s0 }
  0x40   :  { %p657_p2 = por %p656_p1, %p655_p0 }
  0x42   :  { %p658_p3 = pnand %p657_p2, %p651_p13 }
  0x44   :  { %661 = shalt.err (!%p658_p3)
}
  0x45   :  { %57 = dma.hbm_to_vmem [thread:$0]  %s883_s5, 512, %s52_s29, [#allocation5], %s715_s19, %s715_s19, %s716_s20  }
  0x46   :  { %s662_s22 = scalar_lea.hbm %s885_s7, 512 }
  0x47   :  { %p663_p4 = scmp.ne.s32.totalorder %s885_s7, %s662_s22  ;;  %p666_p5 = scmp.lt.u32.totalorder %s662_s22, %s885_s7 }
  0x49   :  { %p668_p6 = pnand %p666_p5, %p663_p4 }
  0x4b   :  { %671 = shalt.err (!%p668_p6)
}
  0x4c   :  { %s672_s24 = scalar_lea.vmem %s74_s11, 512  ;;  %p677_p8 = scmp.lt.s32.totalorder %s74_s11, %s74_s11 }
  0x4d   :  { %p673_p7 = scmp.ne.s32.totalorder %s74_s11, %s672_s24  ;;  %p678_p9 = scmp.lt.s32.totalorder %s672_s24, %s672_s24 }
  0x4f   :  { %p679_p10 = por %p678_p9, %p677_p8 }
  0x51   :  { %p680_p11 = pnand %p679_p10, %p673_p7 }
  0x53   :  { %683 = shalt.err (!%p680_p11)
}
  0x54   :  { %79 = dma.hbm_to_vmem [thread:$0]  %s885_s7, 512, %s74_s11, [#allocation8], %s715_s19, %s715_s19, %s716_s20  }
  0x55   :  { %s721_s29 = smov [#allocation10]   ;;  %s684_s3 = scalar_lea.hbm %s886_s8, 16 }
  0x56   :  { %s86_s30 = sshll.u32 %s721_s29, 4  ;;  %p685_p12 = scmp.ne.s32.totalorder %s886_s8, %s684_s3  ;;  %s87_s30 = int_to_ptr.vmem [resolvable:$true] %s86_s30 }
  0x57   :  { %p688_p13 = scmp.lt.u32.totalorder %s684_s3, %s886_s8 }
  0x59   :  { %p690_p0 = pnand %p688_p13, %p685_p12 }
  0x5b   :  { %693 = shalt.err (!%p690_p0)
}
  0x5c   :  { %s694_s0 = scalar_lea.vmem %s87_s30, 16  ;;  %s698_s7 = scalar_lea.vmem %s87_s30, 32 }
  0x5d   :  { %p695_p1 = scmp.ne.s32.totalorder %s87_s30, %s694_s0  ;;  %p699_p2 = scmp.lt.s32.totalorder %s87_s30, %s87_s30 }
  0x5e   :  { %p700_p3 = scmp.lt.s32.totalorder %s698_s7, %s694_s0 }
  0x60   :  { %p701_p4 = por %p700_p3, %p699_p2 }
  0x62   :  { %p702_p5 = pnand %p701_p4, %p695_p1 }
  0x64   :  { %705 = shalt.err (!%p702_p5)
}
  0x65   :  { %89 = dma.hbm_to_vmem [thread:$0]  %s886_s8, 16, %s87_s30, [#allocation11]  }
  0x66   :  { %706 = dma.done.wait [#allocation3], 32  }
  0x67   :  { %707 = vsyncadd [#allocation3], 4294967264 }
  0x68   :  { %708 = dma.done.wait [#allocation5], 1024  }
  0x69   :  { %709 = vsyncadd [#allocation5], 4294966272 }
  0x6a   :  { %710 = dma.done.wait [#allocation8], 528  }
  0x6b   :  { %711 = vsyncadd [#allocation8], 4294966768 }
  0x6c   :  { %712 = dma.done.wait [#allocation11], 16  }
  0x6d   :  { %713 = vsyncadd [#allocation11], 4294967280  ;;  %v722_v0 = vmov 0.0|0.0   ;;  %vm723_vm0 = vmmov 0   ;;  %v724_v1 = vmov 0.0   ;;  %v109_v2 = vld [vmem:[%s879_s1] sm:$0xff] }
  0x6e   :  { %538 = vmatprep.subr.bf16.mxu0 %v722_v0  ;;  %502 = vmatprep.mubr.msk.f32.mxu0 %vm723_vm0, %v724_v1  ;;  %v110_v3 = vld [vmem:[%s879_s1 + $0x8] sm:$0xff]  ;;  %v193_v5 = vld [vmem:[#allocation4] sm:$0xff]  ;;  %v194_v6 = vld [vmem:[#allocation4 + $0x8] sm:$0xff]  ;;  %vm118_vm1 = vcmask 130048   ;;  %vm204_vm2 = vcmask 261120  }
  0x6f   :  { %541 = vmatprep.subr.bf16.mxu1 %v722_v0  ;;  %513 = vmatprep.mubr.msk.f32.mxu1 %vm723_vm0, %v724_v1  ;;  %v539_v4 = vpack.c.bf16 %v110_v3, %v109_v2  ;;  %v542_v7 = vpack.c.bf16 %v194_v6, %v193_v5  ;;  %v108_v8 = vld [vmem:[#allocation2] sm:$0x3]  ;;  %v195_v9 = vld [vmem:[#allocation4 + $0x10] sm:$0xff]  ;;  %v279_v12 = vld [vmem:[#allocation6] sm:$0xff] }
  0x70   :  { %v196_v10 = vld [vmem:[#allocation4 + $0x18] sm:$0xff]  ;;  %v280_v13 = vld [vmem:[#allocation6 + $0x8] sm:$0xff]  ;;  %v281_v20 = vld [vmem:[#allocation6 + $0x10] sm:$0xff] }
  0x71   :  { %540 = vmatpush3.bf16.msra.mxu0 %v539_v4  ;;  %543 = vmatpush3.bf16.msra.mxu1 %v542_v7  ;;  %v545_v11 = vpack.c.bf16 %v196_v10, %v195_v9  ;;  %v548_v14 = vpack.c.bf16 %v280_v13, %v279_v12  ;;  %v472_v15 = vld [vmem:[%s880_s2] ss:$0 sm:$0xff]  ;;  %v282_v21 = vld [vmem:[#allocation6 + $0x18] sm:$0xff]  ;;  %v364_v23 = vld [vmem:[#allocation9] sm:$0xff] }
  0x72   :  { %547 = vmatprep.subr.bf16.mxu0 %v722_v0  ;;  %544 = vmatprep.subr.bf16.mxu1 %v722_v0  ;;  %v551_v22 = vpack.c.bf16 %v282_v21, %v281_v20  ;;  %v365_v24 = vld [vmem:[#allocation9 + $0x8] sm:$0xff]  ;;  %v366_v31 = vld [vmem:[#allocation9 + $0x10] sm:$0xff]  ;;  %v367_v32 = vld [vmem:[#allocation9 + $0x18] sm:$0xff] }
  0x73   :  { %v554_v25 = vpack.c.bf16 %v365_v24, %v364_v23  ;;  %v474_v26 = vld [vmem:[%s882_s4] ss:$0 sm:$0xff]  ;;  %v557_v33 = vpack.c.bf16 %v367_v32, %v366_v31  ;;  %v476_v34 = vld [vmem:[#allocation7] ss:$0 sm:$0xff]  ;;  %v478_v39 = vld [vmem:[#allocation10] ss:$0 sm:$0xff] }
  0x74   :  { %503 = vmatmul.mubr.msk.f32.vlgmr.msra.gmra.mrb[0].mxu0 %vm118_vm1, %v108_v8 }
  0x75   :  { %524 = vmatprep.mubr.msk.f32.mxu0 %vm723_vm0, %v724_v1  ;;  %546 = vmatpush3.bf16.msra.mxu1 %v545_v11 }
  0x76   :  { %553 = vmatprep.subr.bf16.mxu1 %v722_v0  ;;  %549 = vmatpush3.bf16.msra.mxu0 %v548_v14 }
  0x77   :  { %550 = vmatprep.subr.bf16.mxu0 %v722_v0 }
  0x7a   :  { %552 = vmatpush3.bf16.msra.mxu0 %v551_v22 }
 0x147   :  { %v188_v16 = vpop.f32.mrb[0].mxu0 }
 0x148   :  { %v189_v17 = vadd.f32 %v472_v15, %v188_v16  ;;  %v504_v18 = vpop.f32.mrb[1].mxu0 }
 0x14a   :  { %v192_v19 = vmax.f32 %v189_v17, 0.0 }
 0x14c   :  { %514 = vmatmul.mubr.msk.f32.vlgmr.msra.gmra.mrb[0].mxu1 %vm204_vm2, %v192_v19 }
 0x14d   :  { %535 = vmatprep.mubr.msk.f32.mxu1 %vm723_vm0, %v724_v1  ;;  %555 = vmatpush3.bf16.msra.mxu1 %v554_v25 }
 0x14e   :  { %556 = vmatprep.subr.bf16.mxu1 %v722_v0 }
 0x151   :  { %558 = vmatpush3.bf16.msra.mxu1 %v557_v33 }
 0x21f   :  { %v274_v27 = vpop.f32.mrb[0].mxu1 }
 0x220   :  { %v275_v28 = vadd.f32 %v474_v26, %v274_v27  ;;  %v515_v29 = vpop.f32.mrb[1].mxu1 }
 0x222   :  { %v278_v30 = vmax.f32 %v275_v28, 0.0 }
 0x224   :  { %525 = vmatmul.mubr.msk.f32.vlgmr.msra.gmra.mrb[2].mxu0 %vm204_vm2, %v278_v30 }
 0x2f7   :  { %v359_v35 = vpop.f32.mrb[2].mxu0 }
 0x2f8   :  { %v360_v36 = vadd.f32 %v476_v34, %v359_v35  ;;  %v526_v37 = vpop.f32.mrb[3].mxu0 }
 0x2fa   :  { %v363_v38 = vmax.f32 %v360_v36, 0.0 }
 0x2fc   :  { %536 = vmatmul.mubr.msk.f32.vlgmr.msra.gmra.mrb[2].mxu1 %vm204_vm2, %v363_v38 }
 0x3cf   :  { %v444_v40 = vpop.f32.mrb[2].mxu1 }
 0x3d0   :  { %v445_v41 = vadd.f32 %v478_v39, %v444_v40  ;;  %v537_v42 = vpop.f32.mrb[3].mxu1 }
 0x3d2   :  { %v449_v43 = vmin.f32 %v445_v41, 20.0  ;;  %vm448_vm4 = vcmp.gt.f32.partialorder %v445_v41, 20.0 }
 0x3d4   :  { %v450_v44 = vmul.f32 1.442695, %v449_v43 }
 0x3d6   :  { %570 = vpow2.f32 %v450_v44 }
 0x3e0   :  { %v571_v45 = vpop.eup %570 }
 0x3e1   :  { %v452_v46 = vadd.f32 1.0, %v571_v45  ;;  %v455_v47 = vmul.f32 -0.5, %v571_v45  ;;  %v458_v49 = vand.u32 2147483647, %v571_v45 }
 0x3e3   :  { %572 = vlog2.f32 %v452_v46  ;;  %v456_v48 = vadd.f32 1.0, %v455_v47  ;;  %vm459_vm3 = vcmp.lt.f32.partialorder %v458_v49, 0.0004427343 }
 0x3e5   :  { %v457_v52 = vmul.f32 %v571_v45, %v456_v48 }
 0x3ed   :  { %v573_v50 = vpop.eup %572 }
 0x3ee   :  { %v454_v51 = vmul.f32 0.6931472, %v573_v50 }
 0x3f0   :  { %v460_v53 = vsel %vm459_vm3, %v457_v52, %v454_v51 }
 0x3f1   :  { %v461_v54 = vsel %vm448_vm4, %v445_v41, %v460_v53 }
 0x3f2   :  { %v462_v55 = vadd.f32 0.001, %v461_v54 }
 0x3f4   :  { %463 = vst [vmem:[%s887_s9] sm:$0x3] %v462_v55 }
 0x3f5   :  { %468 = vsyncpa [#allocation3], 1 }
 0x3f6   :  { %469 = vsyncpa [#allocation5], 1 }
 0x3f7   :  { %470 = vsyncpa [#allocation8], 1 }
 0x3f8   :  { %471 = vsyncpa [#allocation11], 1 }

</bundles_post_ra>
